<compile_context>
chip_gen: v6e
topology: v6e:2x2x1
jax: 0.10.0
libtpu: 0.0.40
codegen_flags: <defaults>
</compile_context>

<pallas_src>
import math

import jax
import jax.numpy as jnp
from jax.experimental import pallas as pl
from jax.experimental.pallas import tpu as pltpu


def _disc_kernel(wc_ref, hpl_ref, hmi_ref, b_ref, out_ref):
    # wc_ref : (1, H)   VMEM  precomputed W @ c (resident across all tiles)
    # hpl_ref: (TN, H)  VMEM  positive-sample tile (native dtype)
    # hmi_ref: (TN, H)  VMEM  negative-sample tile (native dtype)
    # b_ref  : (1, 1)   SMEM  bilinear bias scalar (f32)
    # out_ref: (2, TN)  VMEM  row 0 = sc_1 tile, row 1 = sc_2 tile (lane-dense f32)
    wc = wc_ref[...]                      # (1, H)
    bias = b_ref[0, 0]                    # scalar f32
    contract = (((1,), (1,)), ((), ()))   # contract H (lhs dim 1) with H (rhs dim 1)

    s1 = jax.lax.dot_general(             # (1, TN), f32 accumulate on MXU
        wc, hpl_ref[...], dimension_numbers=contract,
        preferred_element_type=jnp.float32)
    s2 = jax.lax.dot_general(
        wc, hmi_ref[...], dimension_numbers=contract,
        preferred_element_type=jnp.float32)

    out_ref[0:1, :] = s1 + bias
    out_ref[1:2, :] = s2 + bias


def _choose_tile_rows(N, H, itemsize, target_bytes=2 << 20, min_programs=4):
    """Rows per tile.

    ~target_bytes per streaming input tile (HBM-bandwidth-bound regime: big
    enough to amortize the ~0.35us per-grid-step overhead), a multiple of 128
    (so the lane-dense (2, TN) output block satisfies the (.., 128) tiling
    rule), and capped so the parallel N axis has >= min_programs steps so a
    2-TC chip (v7x) / megacore can split the work.
    """
    tn = max(1, target_bytes // (H * itemsize))
    tn = max(128, (tn // 128) * 128)
    cap = ((pl.cdiv(N, min_programs) + 127) // 128) * 128
    tn = min(tn, max(128, cap))
    if tn >= N:
        return int(N)      # single full-extent block: no divisibility constraints
    return int(tn)


def discriminator_forward(c, h_pl, h_mi, weight, bias,
                          s_bias1=None, s_bias2=None, tile_rows=None):
    """Pallas equivalent of Discriminator.forward.

    c      : (n_h,)      summary vector (expanded across rows, as in the module)
    h_pl   : (N, n_h)    positive samples
    h_mi   : (N, n_h)    negative (corrupted) samples
    weight : (n_h, n_h)  nn.Bilinear weight with the out_features=1 axis squeezed
    bias   : (1,)        nn.Bilinear bias
    returns: (2N,)       logits = concat(sc_1, sc_2)
    """
    N, H = h_pl.shape
    act_dtype = h_pl.dtype
    itemsize = jnp.dtype(act_dtype).itemsize

    # Hoist W @ c out of the kernel (cheap XLA matvec). Keep wc in f32 when the
    # activations are f32; for bf16 activations wc is cast to bf16 so the MXU
    # contraction stays native-dtype (f32 accumulate) -- slightly looser than a
    # full-precision nn.Bilinear, matching the streaming-input choice.
    wc_f32 = weight.astype(jnp.float32) @ c.astype(jnp.float32)
    wc = wc_f32.reshape(1, H).astype(act_dtype)
    b2 = bias.reshape(1, 1).astype(jnp.float32)

    # Tile over N (parallel axis).
    if tile_rows is not None:
        tn = int(N) if tile_rows >= N else max(128, (int(tile_rows) // 128) * 128)
    else:
        tn = _choose_tile_rows(N, H, itemsize)
    grid = (pl.cdiv(N, tn),)

    # Derive the VMEM limit from the actual double-buffered working set
    # (2 streaming inputs x 2 buffers x tile, plus wc and the small output),
    # clamped well inside v7x's 64 MiB physical VMEM.
    tile_in_bytes = tn * H * itemsize
    working_set = 2 * 2 * tile_in_bytes + 2 * H * itemsize + 2 * 2 * tn * 4
    vmem_limit = int(min(64 << 20, max(16 << 20, 4 * working_set)))

    cost = pl.CostEstimate(
        flops=4 * N * H,                                   # two length-H dots per row
        transcendentals=0,
        bytes_accessed=2 * N * H * itemsize + H * itemsize + 2 * N * 4,
    )

    out = pl.pallas_call(
        _disc_kernel,
        out_shape=jax.ShapeDtypeStruct((2, N), jnp.float32),
        grid=grid,
        in_specs=[
            pl.BlockSpec((1, H), lambda i: (0, 0)),        # wc, resident across tiles
            pl.BlockSpec((tn, H), lambda i: (i, 0)),       # h_pl tile
            pl.BlockSpec((tn, H), lambda i: (i, 0)),       # h_mi tile
            pl.BlockSpec(memory_space=pltpu.SMEM),         # bias scalar
        ],
        out_specs=pl.BlockSpec((2, tn), lambda i: (0, i)), # lane-dense merged output
        compiler_params=pltpu.CompilerParams(
            dimension_semantics=("parallel",),
            vmem_limit_bytes=vmem_limit,
        ),
        cost_estimate=cost,
    )(wc, h_pl, h_mi, b2)

    if s_bias1 is None and s_bias2 is None:
        # out is (2, N) row-major -> flattening IS concat(sc_1, sc_2).
        return out.reshape(2 * N)

    sc_1 = out[0]
    sc_2 = out[1]
    if s_bias1 is not None:
        sc_1 = sc_1 + s_bias1
    if s_bias2 is not None:
        sc_2 = sc_2 + s_bias2
    return jnp.concatenate([sc_1, sc_2], axis=0)


def init_discriminator_params(key, n_h):
    """Deterministic xavier-uniform init matching nn.Bilinear(n_h, n_h, 1)."""
    # PyTorch weight shape (1, n_h, n_h): fan_in = n_h * n_h, fan_out = 1 * n_h
    fan_in = n_h * n_h
    fan_out = 1 * n_h
    bound = math.sqrt(6.0 / (fan_in + fan_out))
    weight = jax.random.uniform(key, (n_h, n_h), jnp.float32, -bound, bound)
    bias = jnp.zeros((1,), jnp.float32)
    return weight, bias


def _reference(c, h_pl, h_mi, weight, bias):
    wc = weight @ c                       # (n_h,)
    sc1 = h_pl @ wc + bias[0]             # (N,)
    sc2 = h_mi @ wc + bias[0]             # (N,)
    return jnp.concatenate([sc1, sc2], axis=0)


if __name__ == "__main__":
    key = jax.random.PRNGKey(0)
    k_w, k_c, k_pl, k_mi = jax.random.split(key, 4)

    # --- small single-tile case --------------------------------------------
    n_h, N = 32, 8
    weight, bias = init_discriminator_params(k_w, n_h)
    c = jax.random.normal(k_c, (n_h,), jnp.float32)
    h_pl = jax.random.normal(k_pl, (N, n_h), jnp.float32)
    h_mi = jax.random.normal(k_mi, (N, n_h), jnp.float32)

    logits = jax.block_until_ready(discriminator_forward(c, h_pl, h_mi, weight, bias))
    ref = _reference(c, h_pl, h_mi, weight, bias)
    assert logits.shape == (2 * N,)
    assert jnp.allclose(logits, ref, atol=1e-5, rtol=1e-5)

    # --- s_bias path ---------------------------------------------------------
    sb1 = jnp.full((N,), 0.5, jnp.float32)
    sb2 = jnp.full((N,), -0.25, jnp.float32)
    logits_b = jax.block_until_ready(
        discriminator_forward(c, h_pl, h_mi, weight, bias, s_bias1=sb1, s_bias2=sb2))
    ref_b = ref + jnp.concatenate([sb1, sb2], axis=0)
    assert jnp.allclose(logits_b, ref_b, atol=1e-5, rtol=1e-5)

    # --- multi-tile case with a partial last block (exercises parallel grid) --
    n_h2, N2 = 128, 400          # adaptive tn = 128 -> grid = 4, last block partial
    weight2, bias2 = init_discriminator_params(jax.random.fold_in(k_w, 1), n_h2)
    c2 = jax.random.normal(jax.random.fold_in(k_c, 1), (n_h2,), jnp.float32)
    h_pl2 = jax.random.normal(jax.random.fold_in(k_pl, 1), (N2, n_h2), jnp.float32)
    h_mi2 = jax.random.normal(jax.random.fold_in(k_mi, 1), (N2, n_h2), jnp.float32)

    logits2 = jax.block_until_ready(
        discriminator_forward(c2, h_pl2, h_mi2, weight2, bias2))
    ref2 = _reference(c2, h_pl2, h_mi2, weight2, bias2)
    assert logits2.shape == (2 * N2,)
    assert jnp.allclose(logits2, ref2, atol=1e-5, rtol=1e-5)

    print("KERNEL_OK")
</pallas_src>

<mosaic_0001>
module attributes {stable_mosaic.version = 11 : i64} {
  func.func @_disc_kernel(%arg0: i32, %arg1: memref<1x32xf32, #tpu.memory_space<vmem>>, %arg2: memref<8x32xf32, #tpu.memory_space<vmem>>, %arg3: memref<8x32xf32, #tpu.memory_space<vmem>>, %arg4: memref<1x1xf32, #tpu.memory_space<smem>>, %arg5: memref<2x8xf32, #tpu.memory_space<vmem>>) attributes {dimension_semantics = [#tpu.dimension_semantics<parallel>], iteration_bounds = array<i64: 1>, scalar_prefetch = 0 : i64, scratch_operands = 0 : i64, tpu.core_type = #tpu.core_type<tc>, window_params = [{pipeline_mode = #tpu.pipeline_mode<synchronous>, transform_indices = @transform_0, window_bounds = array<i64: 1, 32>}, {transform_indices = @transform_1, window_bounds = array<i64: 8, 32>}, {transform_indices = @transform_2, window_bounds = array<i64: 8, 32>}, {transform_indices = @transform_3, window_bounds = array<i64: 1, 1>}, {transform_indices = @transform_4, window_bounds = array<i64: 2, 8>}]} {
    %c0 = arith.constant 0 : index
    %c0_0 = arith.constant 0 : index
    %0 = vector.load %arg1[%c0, %c0_0] : memref<1x32xf32, #tpu.memory_space<vmem>>, vector<1x32xf32>
    %c0_1 = arith.constant 0 : index
    %c0_2 = arith.constant 0 : index
    %1 = memref.load %arg4[%c0_1, %c0_2] : memref<1x1xf32, #tpu.memory_space<smem>>
    %c0_3 = arith.constant 0 : index
    %c0_4 = arith.constant 0 : index
    %2 = vector.load %arg2[%c0_3, %c0_4] : memref<8x32xf32, #tpu.memory_space<vmem>>, vector<8x32xf32>
    %cst = arith.constant dense<0.000000e+00> : vector<1x8xf32>
    %3 = tpu.matmul %0, %2, %cst {dimension_numbers = #tpu.dot_dimension_numbers<[1], [1], [0], [0], [0, 0, 1, 0], [], []>} : vector<1x32xf32>, vector<8x32xf32>, vector<1x8xf32> -> vector<1x8xf32>
    %c0_5 = arith.constant 0 : index
    %c0_6 = arith.constant 0 : index
    %4 = vector.load %arg3[%c0_5, %c0_6] : memref<8x32xf32, #tpu.memory_space<vmem>>, vector<8x32xf32>
    %cst_7 = arith.constant dense<0.000000e+00> : vector<1x8xf32>
    %5 = tpu.matmul %0, %4, %cst_7 {dimension_numbers = #tpu.dot_dimension_numbers<[1], [1], [0], [0], [0, 0, 1, 0], [], []>} : vector<1x32xf32>, vector<8x32xf32>, vector<1x8xf32> -> vector<1x8xf32>
    %6 = vector.broadcast %1 : f32 to vector<1x8xf32>
    %7 = arith.addf %3, %6 : vector<1x8xf32>
    %c0_8 = arith.constant 0 : index
    %c0_9 = arith.constant 0 : index
    %8 = vector.load %arg5[%c0_8, %c0_9] : memref<2x8xf32, #tpu.memory_space<vmem>>, vector<1x8xf32>
    tpu.vector_store %arg5[%c0_8, %c0_9], %7 {strides = array<i32>} : memref<2x8xf32, #tpu.memory_space<vmem>>, vector<1x8xf32>,
    %9 = vector.broadcast %1 : f32 to vector<1x8xf32>
    %10 = arith.addf %5, %9 : vector<1x8xf32>
    %c1 = arith.constant 1 : index
    %c0_10 = arith.constant 0 : index
    %11 = vector.load %arg5[%c1, %c0_10] : memref<2x8xf32, #tpu.memory_space<vmem>>, vector<1x8xf32>
    tpu.vector_store %arg5[%c1, %c0_10], %10 {strides = array<i32>} : memref<2x8xf32, #tpu.memory_space<vmem>>, vector<1x8xf32>,
    return
  }
  func.func @transform_0(%arg0: i32) -> (i32, i32) {
    %c0_i32 = arith.constant 0 : i32
    %c0_i32_0 = arith.constant 0 : i32
    %c0_i32_1 = arith.constant 0 : i32
    return %c0_i32, %c0_i32_0 : i32, i32
  }
  func.func @transform_1(%arg0: i32) -> (i32, i32) {
    %c0_i32 = arith.constant 0 : i32
    %c0_i32_0 = arith.constant 0 : i32
    return %arg0, %c0_i32 : i32, i32
  }
  func.func @transform_2(%arg0: i32) -> (i32, i32) {
    %c0_i32 = arith.constant 0 : i32
    %c0_i32_0 = arith.constant 0 : i32
    return %arg0, %c0_i32 : i32, i32
  }
  func.func @transform_3(%arg0: i32) -> (i32, i32) {
    %c0_i32 = arith.constant 0 : i32
    %c0_i32_0 = arith.constant 0 : i32
    %c0_i32_1 = arith.constant 0 : i32
    return %c0_i32, %c0_i32_0 : i32, i32
  }
  func.func @transform_4(%arg0: i32) -> (i32, i32) {
    %c0_i32 = arith.constant 0 : i32
    %c0_i32_0 = arith.constant 0 : i32
    return %c0_i32, %arg0 : i32, i32
  }
}

</mosaic_0001>

<bundles_post_ra>
// kernel: tpu_custom_call.1
= control target key start
LH: loop header
LB: loop body
LE: loop exit
PB: predicated region body
PF: predicated region fallthrough
CT: control target
= control target key end

     0   :  { %10 = vsyncpa [#allocation4], 0  ;;  %s351_s0 = inlined_call_operand.vmem [shape: f32[1,32], index: 0, kind: input, shape index: {}]   ;;  %s352_s1 = inlined_call_operand.hbm [shape: f32[8,32], index: 1, kind: input, shape index: {}]   ;;  %s353_s2 = inlined_call_operand.hbm [shape: f32[8,32], index: 2, kind: input, shape index: {}]   ;;  %s354_s3 = inlined_call_operand.<no memory space> [shape: f32[1,1], index: 3, kind: input, shape index: {}]   ;;  %s355_s4 = inlined_call_operand.hbm [shape: f32[2,8], index: 4, kind: output, shape index: {}]  }
   0x1   :  { %11 = vsyncpa [#allocation7], 0 }
   0x2   :  { %12 = vsyncpa [#allocation5], 0  ;;  %s306_s15 = smov [#allocation3]   ;;  %s307_s17 = smov [#allocation6]  }
   0x3   :  { %s21_s16 = sshll.u32 %s306_s15, 4  ;;  %s31_s18 = sshll.u32 %s307_s17, 4  ;;  %s22_s16 = int_to_ptr.vmem [resolvable:$true] %s21_s16  ;;  %s32_s18 = int_to_ptr.vmem [resolvable:$true] %s31_s18 }
   0x4   :  { %s248_s19 = scalar_lea.vmem %s22_s16, 128  ;;  %p253_p1 = scmp.lt.s32.totalorder %s22_s16, %s22_s16 }
   0x5   :  { %p249_p0 = scmp.ne.s32.totalorder %s22_s16, %s248_s19  ;;  %p254_p2 = scmp.lt.s32.totalorder %s248_s19, %s248_s19 }
   0x7   :  { %p255_p3 = por %p254_p2, %p253_p1 }
   0x9   :  { %p256_p4 = pnand %p255_p3, %p249_p0 }
   0xb   :  { %259 = shalt.err (!%p256_p4)
}
   0xc   :  { %24 = dma.hbm_to_vmem [thread:$0]  %s352_s1, 128, %s22_s16, [#allocation4]  }
   0xd   :  { %s268_s22 = scalar_lea.vmem %s32_s18, 128  ;;  %p273_p6 = scmp.lt.s32.totalorder %s32_s18, %s32_s18 }
   0xe   :  { %p269_p5 = scmp.ne.s32.totalorder %s32_s18, %s268_s22  ;;  %p274_p7 = scmp.lt.s32.totalorder %s268_s22, %s268_s22 }
  0x10   :  { %p275_p8 = por %p274_p7, %p273_p6 }
  0x12   :  { %p276_p9 = pnand %p275_p8, %p269_p5 }
  0x14   :  { %279 = shalt.err (!%p276_p9)
}
  0x15   :  { %34 = dma.hbm_to_vmem [thread:$0]  %s353_s2, 128, %s32_s18, [#allocation7]  }
  0x16   :  { %300 = dma.done.wait [#allocation4], 128  }
  0x17   :  { %301 = vsyncadd [#allocation4], 4294967168 }
  0x18   :  { %302 = dma.done.wait [#allocation7], 128  }
  0x19   :  { %303 = vsyncadd [#allocation7], 4294967168  ;;  %v308_v0 = vmov 0.0   ;;  %vm309_vm0 = vmmov 0   ;;  %vm48_vm1 = vcmask 261120   ;;  %v45_v1 = vld [vmem:[#allocation3] sm:$0xff]  ;;  %v47_v4 = vstv %s354_s3 }
  0x1a   :  { %225 = vmatprep.subr.mxu0 %v308_v0  ;;  %230 = vmatprep.subr.mxu1 %v308_v0  ;;  %v46_v2 = vld [vmem:[#allocation6] sm:$0xff]  ;;  %v43_v3 = vld [vmem:[%s351_s0] sm:$0x1]  ;;  %s310_s27 = smov [#allocation8]   ;;  %vm125_vm2 = vcmask 57344  }
  0x1b   :  { %227 = vmatprep.mubr.msk.f32.mxu0 %vm309_vm0, %v308_v0  ;;  %232 = vmatprep.mubr.msk.f32.mxu1 %vm309_vm0, %v308_v0  ;;  %s207_s28 = sshll.u32 %s310_s27, 4  ;;  %s208_s28 = int_to_ptr.vmem [resolvable:$true] %s207_s28 }
  0x1c   :  { %226 = vmatpush3.xpose.msk.msra.mxu0 %vm48_vm1, %v45_v1  ;;  %231 = vmatpush3.xpose.msk.msra.mxu1 %vm48_vm1, %v46_v2  ;;  %s280_s29 = scalar_lea.vmem %s208_s28, 32  ;;  %p285_p11 = scmp.lt.s32.totalorder %s208_s28, %s208_s28 }
  0x1d   :  { %p281_p10 = scmp.ne.s32.totalorder %s208_s28, %s280_s29  ;;  %p286_p12 = scmp.lt.s32.totalorder %s280_s29, %s280_s29 }
  0x1f   :  { %228 = vmatmul.mubr.msk.f32.vlgmr.msra.gmra.mxu0 %vm48_vm1, %v43_v3  ;;  %233 = vmatmul.mubr.msk.f32.vlgmr.msra.gmra.mxu1 %vm48_vm1, %v43_v3  ;;  %p287_p13 = por %p286_p12, %p285_p11 }
  0x21   :  { %p288_p0 = pnand %p287_p13, %p281_p10 }
  0xdf   :  { %v121_v5 = vpop.f32.mrf.mxu0  ;;  %v196_v6 = vpop.f32.mrf.mxu1 }
  0xe0   :  { %v122_v7 = vadd.f32 %v121_v5, %v47_v4  ;;  %v197_v8 = vadd.f32 %v196_v6, %v47_v4 }
  0xe1   :  { %v229_v9 = vpop.f32.mrf.mxu0  ;;  %v234_v10 = vpop.f32.mrf.mxu1 }
  0xe2   :  { %126 = vst.msk [vmem:[#allocation8] sm:$0x1] %vm125_vm2, %v122_v7  ;;  %200 = vst.msk [vmem:[#allocation8 + $0x1] sm:$0x1] %vm125_vm2, %v197_v8 }
  0xe3   :  { %291 = shalt.err (!%p288_p0)
}
  0xe4   :  { %210 = dma.vmem_to_hbm [thread:$0]  %s208_s28, 32, %s355_s4, [#allocation5]  }
  0xe5   :  { %304 = dma.done.wait [#allocation5], 32  }
  0xe6   :  { %305 = vsyncadd [#allocation5], 4294967264 }
  0xe7   :  { %214 = vsyncpa [#allocation4], 1 }
  0xe8   :  { %215 = vsyncpa [#allocation7], 1 }
  0xe9   :  { %216 = vsyncpa [#allocation5], 1 }

</bundles_post_ra>
